<compile_context>
chip_gen: v5e
topology: v5e:2x2
jax: 0.10.0
libtpu: 0.0.40
codegen_flags: <defaults>
</compile_context>

<pallas_src>
import math

import jax
import jax.numpy as jnp
from jax.experimental import pallas as pl
from jax.experimental.pallas import tpu as pltpu


# ----------------------------- kernels --------------------------------------

def _linear_kernel_multi_k_bias(x_ref, w_ref, b_ref, o_ref, acc_ref):
    """(tm, tn) output tile; K reduction over grid axis 2; fused bias add."""
    k = pl.program_id(2)

    @pl.when(k == 0)
    def _init():
        acc_ref[...] = jnp.zeros_like(acc_ref)

    acc_ref[...] += jnp.dot(
        x_ref[...], w_ref[...], preferred_element_type=jnp.float32
    )

    @pl.when(k == pl.num_programs(2) - 1)
    def _finalize():
        o_ref[...] = (acc_ref[...] + b_ref[...]).astype(o_ref.dtype)


def _linear_kernel_multi_k_nobias(x_ref, w_ref, o_ref, acc_ref):
    k = pl.program_id(2)

    @pl.when(k == 0)
    def _init():
        acc_ref[...] = jnp.zeros_like(acc_ref)

    acc_ref[...] += jnp.dot(
        x_ref[...], w_ref[...], preferred_element_type=jnp.float32
    )

    @pl.when(k == pl.num_programs(2) - 1)
    def _finalize():
        o_ref[...] = acc_ref[...].astype(o_ref.dtype)


def _linear_kernel_single_k_bias(x_ref, w_ref, b_ref, o_ref):
    """Whole reduction fits one K tile: no accumulator scratch needed."""
    o_ref[...] = (
        jnp.dot(x_ref[...], w_ref[...], preferred_element_type=jnp.float32)
        + b_ref[...]
    ).astype(o_ref.dtype)


def _linear_kernel_single_k_nobias(x_ref, w_ref, o_ref):
    o_ref[...] = jnp.dot(
        x_ref[...], w_ref[...], preferred_element_type=jnp.float32
    ).astype(o_ref.dtype)


# ----------------------------- wrapper ---------------------------------------

def _round_up(n, m):
    return ((n + m - 1) // m) * m


def pallas_linear(x, weight, bias=None, *, compute_dtype=None,
                  tm_max=256, tn_max=256, tk_max=512):
    """y = x @ weight.T + bias, torch nn.Linear layout (weight: (out, in))."""
    *lead, in_dim = x.shape
    out_dim = weight.shape[0]
    out_dtype = x.dtype
    has_bias = bias is not None

    # Fold leading dims into rows (lane/row-dense matmul M dimension).
    M = math.prod(lead) if lead else 1
    x2 = x.reshape(M, in_dim)
    # NOTE: in a real model, pre-transpose / pre-pad the weight once at
    # parameter-prep time instead of on every call.
    w2 = jnp.transpose(weight)                               # (in_dim, out_dim)

    if compute_dtype is not None:
        x2 = x2.astype(compute_dtype)
        w2 = w2.astype(compute_dtype)

    # Tile sizes: (8,128)-aligned, clipped to the (rounded-up) problem size.
    tm = min(tm_max, _round_up(M, 8))
    tn = min(tn_max, _round_up(out_dim, 128))
    tk = min(tk_max, _round_up(in_dim, 128))
    Mp = _round_up(M, tm)
    Np = _round_up(out_dim, tn)
    Kp = _round_up(in_dim, tk)

    # Zero-pad to tile multiples only when needed (zeros contribute nothing to
    # the dot product; padded rows/cols are sliced off after the call).
    if Mp != M or Kp != in_dim:
        x2 = jnp.pad(x2, ((0, Mp - M), (0, Kp - in_dim)))
    if Kp != in_dim or Np != out_dim:
        w2 = jnp.pad(w2, ((0, Kp - in_dim), (0, Np - out_dim)))

    if has_bias:
        b2 = bias.astype(jnp.float32).reshape(1, out_dim)
        if Np != out_dim:
            b2 = jnp.pad(b2, ((0, 0), (0, Np - out_dim)))

    grid = (Mp // tm, Np // tn, Kp // tk)
    single_k = grid[2] == 1

    in_specs = [
        pl.BlockSpec((tm, tk), lambda i, j, k: (i, k)),   # x rows
        pl.BlockSpec((tk, tn), lambda i, j, k: (k, j)),   # weight.T
    ]
    operands = [x2, w2]
    if has_bias:
        in_specs.append(pl.BlockSpec((1, tn), lambda i, j, k: (0, j)))  # bias
        operands.append(b2)

    if single_k:
        kernel = (_linear_kernel_single_k_bias if has_bias
                  else _linear_kernel_single_k_nobias)
        scratch_shapes = []
    else:
        kernel = (_linear_kernel_multi_k_bias if has_bias
                  else _linear_kernel_multi_k_nobias)
        scratch_shapes = [pltpu.VMEM((tm, tn), jnp.float32)]

    in_bytes = jnp.dtype(x2.dtype).itemsize
    out_bytes = jnp.dtype(out_dtype).itemsize
    tile_bytes = (
        2 * (tm * tk + tk * tn + tn) * in_bytes      # double-buffered inputs
        + 2 * tm * tn * out_bytes                    # double-buffered output
        + (0 if single_k else tm * tn * 4)           # f32 accumulator scratch
    )
    vmem_limit = int(min(64 * 2 ** 20, max(2 * tile_bytes, 16 * 2 ** 20)))

    out = pl.pallas_call(
        kernel,
        out_shape=jax.ShapeDtypeStruct((Mp, Np), out_dtype),
        grid_spec=pltpu.PrefetchScalarGridSpec(
            num_scalar_prefetch=0,
            grid=grid,
            in_specs=in_specs,
            out_specs=pl.BlockSpec((tm, tn), lambda i, j, k: (i, j)),
            scratch_shapes=scratch_shapes,
        ),
        compiler_params=pltpu.CompilerParams(
            dimension_semantics=("parallel", "parallel", "arbitrary"),
            vmem_limit_bytes=vmem_limit,
        ),
    )(*operands)

    return out[:M, :out_dim].reshape(*lead, out_dim)


# ----------------------------- test ------------------------------------------

if __name__ == "__main__":
    B, T, in_dim, out_dim = 2, 8, 32, 64
    key = jax.random.PRNGKey(0)
    kx, kw, kb = jax.random.split(key, 3)

    x = jax.random.normal(kx, (B, T, in_dim), dtype=jnp.float32)
    # Xavier-uniform weight (gain('linear') == 1), torch layout (out, in).
    bound = math.sqrt(6.0 / (in_dim + out_dim))
    weight = jax.random.uniform(kw, (out_dim, in_dim), dtype=jnp.float32,
                                minval=-bound, maxval=bound)
    # nn.Linear default bias init: U(-1/sqrt(fan_in), 1/sqrt(fan_in)).
    b_bound = 1.0 / math.sqrt(in_dim)
    bias = jax.random.uniform(kb, (out_dim,), dtype=jnp.float32,
                              minval=-b_bound, maxval=b_bound)

    ref = jnp.einsum("btc,oc->bto", x, weight) + bias
    ref_nobias = jnp.einsum("btc,oc->bto", x, weight)

    # f32 path, with bias.
    out = jax.block_until_ready(pallas_linear(x, weight, bias))
    assert out.shape == (B, T, out_dim)
    assert jnp.allclose(out, ref, atol=1e-4, rtol=1e-4), (
        f"max abs err {jnp.max(jnp.abs(out - ref))}")

    # bias=False path of the module.
    out_nb = jax.block_until_ready(pallas_linear(x, weight, None))
    assert jnp.allclose(out_nb, ref_nobias, atol=1e-4, rtol=1e-4), (
        f"nobias max abs err {jnp.max(jnp.abs(out_nb - ref_nobias))}")

    # bf16 MXU compute path (f32 accumulation).
    out_bf16 = jax.block_until_ready(
        pallas_linear(x, weight, bias, compute_dtype=jnp.bfloat16))
    assert jnp.allclose(out_bf16, ref, atol=3e-2, rtol=3e-2), (
        f"bf16 max abs err {jnp.max(jnp.abs(out_bf16 - ref))}")

    # Multi-K-tile path (forces the accumulator kernel) at a larger hidden dim.
    in_big = 1024
    kx2, kw2 = jax.random.split(kx, 2)
    x_big = jax.random.normal(kx2, (B, T, in_big), dtype=jnp.float32)
    w_big = jax.random.uniform(kw2, (out_dim, in_big), dtype=jnp.float32,
                               minval=-0.05, maxval=0.05)
    ref_big = jnp.einsum("btc,oc->bto", x_big, w_big) + bias
    out_big = jax.block_until_ready(
        pallas_linear(x_big, w_big, bias, tk_max=512))
    assert jnp.allclose(out_big, ref_big, atol=1e-3, rtol=1e-3), (
        f"multi-k max abs err {jnp.max(jnp.abs(out_big - ref_big))}")

    print("KERNEL_OK")
</pallas_src>

<mosaic_0001>
module attributes {stable_mosaic.version = 11 : i64} {
  func.func @_linear_kernel_single_k_bias(%arg0: i32, %arg1: i32, %arg2: i32, %arg3: memref<16x128xf32, #tpu.memory_space<vmem>>, %arg4: memref<128x128xf32, #tpu.memory_space<vmem>>, %arg5: memref<1x128xf32, #tpu.memory_space<vmem>>, %arg6: memref<16x128xf32, #tpu.memory_space<vmem>>) attributes {dimension_semantics = [#tpu.dimension_semantics<parallel>, #tpu.dimension_semantics<parallel>, #tpu.dimension_semantics<arbitrary>], iteration_bounds = array<i64: 1, 1, 1>, scalar_prefetch = 0 : i64, scratch_operands = 0 : i64, tpu.core_type = #tpu.core_type<tc>, window_params = [{transform_indices = @transform_0, window_bounds = array<i64: 16, 128>}, {transform_indices = @transform_1, window_bounds = array<i64: 128, 128>}, {transform_indices = @transform_2, window_bounds = array<i64: 1, 128>}, {transform_indices = @transform_3, window_bounds = array<i64: 16, 128>}]} {
    %c0 = arith.constant 0 : index
    %c0_0 = arith.constant 0 : index
    %0 = vector.load %arg3[%c0, %c0_0] : memref<16x128xf32, #tpu.memory_space<vmem>>, vector<16x128xf32>
    %c0_1 = arith.constant 0 : index
    %c0_2 = arith.constant 0 : index
    %1 = vector.load %arg4[%c0_1, %c0_2] : memref<128x128xf32, #tpu.memory_space<vmem>>, vector<128x128xf32>
    %cst = arith.constant dense<0.000000e+00> : vector<16x128xf32>
    %2 = tpu.matmul %0, %1, %cst {dimension_numbers = #tpu.dot_dimension_numbers<[1], [0], [0], [1], [0, 0, 1, 1], [], []>} : vector<16x128xf32>, vector<128x128xf32>, vector<16x128xf32> -> vector<16x128xf32>
    %c0_3 = arith.constant 0 : index
    %c0_4 = arith.constant 0 : index
    %3 = vector.load %arg5[%c0_3, %c0_4] : memref<1x128xf32, #tpu.memory_space<vmem>>, vector<1x128xf32>
    %4 = vector.broadcast %3 : vector<1x128xf32> to vector<16x128xf32>
    %5 = arith.addf %2, %4 : vector<16x128xf32>
    %c0_5 = arith.constant 0 : index
    %c0_6 = arith.constant 0 : index
    %6 = vector.load %arg6[%c0_5, %c0_6] : memref<16x128xf32, #tpu.memory_space<vmem>>, vector<16x128xf32>
    tpu.vector_store %arg6[%c0_5, %c0_6], %5 {strides = array<i32>} : memref<16x128xf32, #tpu.memory_space<vmem>>, vector<16x128xf32>,
    return
  }
  func.func @transform_0(%arg0: i32, %arg1: i32, %arg2: i32) -> (i32, i32) {
    %c0_i32 = arith.constant 0 : i32
    return %arg0, %arg2 : i32, i32
  }
  func.func @transform_1(%arg0: i32, %arg1: i32, %arg2: i32) -> (i32, i32) {
    %c0_i32 = arith.constant 0 : i32
    return %arg2, %arg1 : i32, i32
  }
  func.func @transform_2(%arg0: i32, %arg1: i32, %arg2: i32) -> (i32, i32) {
    %c0_i32 = arith.constant 0 : i32
    %c0_i32_0 = arith.constant 0 : i32
    return %c0_i32, %arg1 : i32, i32
  }
  func.func @transform_3(%arg0: i32, %arg1: i32, %arg2: i32) -> (i32, i32) {
    %c0_i32 = arith.constant 0 : i32
    return %arg0, %arg1 : i32, i32
  }
}

</mosaic_0001>

<bundles_post_ra>
// kernel: tpu_custom_call.1
= control target key start
LH: loop header
LB: loop body
LE: loop exit
PB: predicated region body
PF: predicated region fallthrough
CT: control target
= control target key end

     0   :  { %8 = vsyncpa [#allocation3], 0  ;;  %s260_s0 = inlined_call_operand.hbm [shape: f32[16,128], index: 0, kind: input, shape index: {}]   ;;  %s261_s1 = inlined_call_operand.hbm [shape: f32[128,128], index: 1, kind: input, shape index: {}]   ;;  %s262_s2 = inlined_call_operand.vmem [shape: f32[1,128], index: 2, kind: input, shape index: {}]   ;;  %s263_s3 = inlined_call_operand.hbm [shape: f32[16,128], index: 3, kind: output, shape index: {}]  }
   0x1   :  { %9 = vsyncpa [#allocation6], 0 }
   0x2   :  { %10 = vsyncpa [#allocation4], 0  ;;  %s15_s14 = sshll.u32 %s260_s0, 4  ;;  %s214_s15 = smov [#allocation2]   ;;  %s16_s14 = int_to_ptr.hbm [resolvable:$true] %s15_s14 }
   0x3   :  { %s17_s16 = sshll.u32 %s214_s15, 4  ;;  %s28_s19 = sshll.u32 %s261_s1, 4  ;;  %s18_s16 = int_to_ptr.vmem [resolvable:$true] %s17_s16  ;;  %s29_s19 = int_to_ptr.hbm [resolvable:$true] %s28_s19 }
   0x4   :  { %s215_s20 = smov 128   ;;  %s216_s21 = smov 8  }
   0x5   :  { %23 = dma.hbm_to_vmem [thread:$0]  %s16_s14, 256, %s18_s16, [#allocation3], %s215_s20, %s215_s20, %s216_s21  }
   0x6   :  { %s217_s22 = smov [#allocation5]  }
   0x7   :  { %s30_s23 = sshll.u32 %s217_s22, 4  ;;  %s31_s23 = int_to_ptr.vmem [resolvable:$true] %s30_s23 }
   0x8   :  { %36 = dma.hbm_to_vmem [thread:$0]  %s29_s19, 2048, %s31_s23, [#allocation6], %s215_s20, %s215_s20, %s216_s21  }
   0x9   :  { %208 = dma.done.wait [#allocation3], 256  }
   0xa   :  { %209 = vsyncadd [#allocation3], 4294967040 }
   0xb   :  { %210 = dma.done.wait [#allocation6], 2048  }
   0xc   :  { %211 = vsyncadd [#allocation6], 4294965248  ;;  %v64_v0 = vld [vmem:[#allocation5 + $0x78] sm:$0xff]  ;;  %v63_v1 = vld [vmem:[#allocation5 + $0x70] sm:$0xff]  ;;  %s218_s24 = smov [#allocation7]   ;;  %s100_s28 = sshll.u32 %s263_s3, 4  ;;  %s101_s28 = int_to_ptr.hbm [resolvable:$true] %s100_s28 }
   0xd   :  { %69 = vmatpush.msra.mxu0 %v64_v0  ;;  %114 = vmatpush.msra.mxu1 %v64_v0  ;;  %v62_v2 = vld [vmem:[#allocation5 + $0x68] sm:$0xff]  ;;  %v61_v3 = vld [vmem:[#allocation5 + $0x60] sm:$0xff]  ;;  %v60_v4 = vld [vmem:[#allocation5 + $0x58] sm:$0xff]  ;;  %s98_s25 = sshll.u32 %s218_s24, 4  ;;  %s99_s25 = int_to_ptr.vmem [resolvable:$true] %s98_s25 }
   0xe   :  { %v59_v5 = vld [vmem:[#allocation5 + $0x50] sm:$0xff]  ;;  %v58_v6 = vld [vmem:[#allocation5 + $0x48] sm:$0xff]  ;;  %v57_v7 = vld [vmem:[#allocation5 + $0x40] sm:$0xff] }
   0xf   :  { %70 = vmatpush.msra.mxu0 %v63_v1  ;;  %115 = vmatpush.msra.mxu1 %v63_v1  ;;  %v56_v8 = vld [vmem:[#allocation5 + $0x38] sm:$0xff]  ;;  %v55_v9 = vld [vmem:[#allocation5 + $0x30] sm:$0xff]  ;;  %v54_v10 = vld [vmem:[#allocation5 + $0x28] sm:$0xff] }
  0x10   :  { %v53_v11 = vld [vmem:[#allocation5 + $0x20] sm:$0xff]  ;;  %v52_v12 = vld [vmem:[#allocation5 + $0x18] sm:$0xff]  ;;  %v51_v13 = vld [vmem:[#allocation5 + $0x10] sm:$0xff] }
  0x11   :  { %71 = vmatpush.msra.mxu0 %v62_v2  ;;  %116 = vmatpush.msra.mxu1 %v62_v2  ;;  %v50_v14 = vld [vmem:[#allocation5 + $0x8] sm:$0xff]  ;;  %v49_v15 = vld [vmem:[#allocation5] sm:$0xff]  ;;  %v47_v16 = vld [vmem:[#allocation2] sm:$0xff] }
  0x12   :  { %v48_v17 = vld [vmem:[#allocation2 + $0x8] sm:$0xff]  ;;  %v135_v18 = vld [vmem:[%s262_s2] ss:$0 sm:$0xff] }
  0x13   :  { %72 = vmatpush.msra.mxu0 %v61_v3  ;;  %117 = vmatpush.msra.mxu1 %v61_v3 }
  0x15   :  { %73 = vmatpush.msra.mxu0 %v60_v4  ;;  %118 = vmatpush.msra.mxu1 %v60_v4 }
  0x17   :  { %74 = vmatpush.msra.mxu0 %v59_v5  ;;  %119 = vmatpush.msra.mxu1 %v59_v5 }
  0x19   :  { %75 = vmatpush.msra.mxu0 %v58_v6  ;;  %120 = vmatpush.msra.mxu1 %v58_v6 }
  0x1b   :  { %76 = vmatpush.msra.mxu0 %v57_v7  ;;  %121 = vmatpush.msra.mxu1 %v57_v7 }
  0x1d   :  { %77 = vmatpush.msra.mxu0 %v56_v8  ;;  %122 = vmatpush.msra.mxu1 %v56_v8 }
  0x1f   :  { %78 = vmatpush.msra.mxu0 %v55_v9  ;;  %123 = vmatpush.msra.mxu1 %v55_v9 }
  0x21   :  { %79 = vmatpush.msra.mxu0 %v54_v10  ;;  %124 = vmatpush.msra.mxu1 %v54_v10 }
  0x23   :  { %80 = vmatpush.msra.mxu0 %v53_v11  ;;  %125 = vmatpush.msra.mxu1 %v53_v11 }
  0x25   :  { %81 = vmatpush.msra.mxu0 %v52_v12  ;;  %126 = vmatpush.msra.mxu1 %v52_v12 }
  0x27   :  { %82 = vmatpush.msra.mxu0 %v51_v13  ;;  %127 = vmatpush.msra.mxu1 %v51_v13 }
  0x29   :  { %83 = vmatpush.msra.mxu0 %v50_v14  ;;  %128 = vmatpush.msra.mxu1 %v50_v14 }
  0x2b   :  { %84 = vmatpush.msra.mxu0 %v49_v15  ;;  %129 = vmatpush.msra.mxu1 %v49_v15 }
  0x2c   :  { %85 = vmatmul.f32.vlgmr.msra.gmra.mxu0 %v47_v16  ;;  %88 = vmatmul.f32.vlgmr.msra.gmra.mxu1 %v48_v17 }
  0xa9   :  { %v86_v19 = vpop.f32.mrf.mxu0  ;;  %v89_v20 = vpop.f32.mrf.mxu1 }
  0xaa   :  { %v87_v21 = vadd.f32 %v135_v18, %v86_v19  ;;  %v90_v22 = vadd.f32 %v135_v18, %v89_v20 }
  0xac   :  { %92 = vst [vmem:[#allocation7] sm:$0xff] %v87_v21 }
  0xad   :  { %93 = vst [vmem:[#allocation7 + $0x8] sm:$0xff] %v90_v22 }
  0xae   :  { %106 = dma.vmem_to_hbm [thread:$0]  %s99_s25, 256, %s101_s28, [#allocation4], %s215_s20, %s215_s20, %s216_s21  }
  0xaf   :  { %212 = dma.done.wait [#allocation4], 256  }
  0xb0   :  { %213 = vsyncadd [#allocation4], 4294967040 }
  0xb1   :  { %111 = vsyncpa [#allocation3], 1 }
  0xb2   :  { %112 = vsyncpa [#allocation6], 1 }
  0xb3   :  { %113 = vsyncpa [#allocation4], 1 }

</bundles_post_ra>
